<compile_context>
chip_gen: v7x
topology: tpu7x:2x2x1
jax: 0.10.0
libtpu: 0.0.40
codegen_flags: <defaults>
</compile_context>

<pallas_src>
import functools

import jax
import jax.numpy as jnp
from jax import lax
from jax.experimental import pallas as pl
from jax.experimental.pallas import tpu as pltpu


def _round_up(a: int, b: int) -> int:
    return ((a + b - 1) // b) * b


def _make_kernel(nCps: int, k: int, nQ: int):
    m = nCps - 1
    dx = 2.0 / (m - 1)            # uniform knot spacing (static)
    t0 = -1.0 - k * dx            # first knot (static)
    inv_dx = 1.0 / dx
    left_lo = k                   # interval index at x = -1
    left_hi = m + k - 1           # interval index at x = +1

    def kernel(x_ref, cp_ref, o_ref):
        x = x_ref[0].astype(jnp.float32)          # (inDim, tile_e)
        inDim, tile_e = x.shape

        xc = jnp.clip(x, -1.0, 1.0)
        # Knot interval from the uniform grid; clamp keeps all band indices valid.
        left = jnp.clip(
            jnp.floor((xc - t0) * inv_dx).astype(jnp.int32), left_lo, left_hi
        )                                          # (inDim, tile_e) int32
        # Normalized coordinate for the de Boor alphas.  Uses the UNCLAMPED x,
        # matching the PyTorch code (extrapolation-like alphas for |x| > 1).
        u = (x - t0) * inv_dx - left.astype(jnp.float32)

        # Compact de Boor: track coefficients of the k+1 gathered control points.
        # Entries are Python 0.0/1.0 literals or (inDim, tile_e) arrays.
        coef = [[1.0 if i == j else 0.0 for i in range(k + 1)] for j in range(k + 1)]

        def scaled(scale, c):
            if isinstance(c, float):
                if c == 0.0:
                    return None
                if c == 1.0:
                    return scale
                return scale * c
            return scale * c

        for r in range(1, k + 1):
            # Denominator (k+1-r)*dx is constant for uniform knots; the dx cancels
            # against u's 1/dx normalization.
            inv_den = 1.0 / float(k + 1 - r)
            for j in range(k, r - 1, -1):
                alpha = (u - float(j - k)) * inv_den          # (inDim, tile_e)
                one_m_alpha = 1.0 - alpha
                new = []
                for i in range(k + 1):
                    a = scaled(one_m_alpha, coef[j - 1][i])
                    b_ = scaled(alpha, coef[j][i])
                    if a is None and b_ is None:
                        new.append(0.0)
                    elif a is None:
                        new.append(b_)
                    elif b_ is None:
                        new.append(a)
                    else:
                        new.append(a + b_)
                coef[j] = new

        bcoef = coef[k]   # k+1 basis weights, each (inDim, tile_e) (or float when k=0)

        # Banded basis over the padded control-point axis, as one fused
        # compare+select chain:  basis[i, q, e] = bcoef[p][i, e] iff q == left-k+p.
        iota_q = lax.broadcasted_iota(jnp.int32, (1, nQ, 1), 1)
        d = iota_q - left[:, None, :] + k                      # (inDim, nQ, tile_e)
        basis = jnp.zeros((), jnp.float32)
        for p in range(k + 1):
            bp = bcoef[p]
            bp_b = jnp.float32(bp) if isinstance(bp, float) else bp[:, None, :]
            basis = jnp.where(d == p, bp_b, basis)
        basis = jnp.broadcast_to(basis, (inDim, nQ, tile_e)).astype(jnp.float32)

        # nQ is a multiple of 8 -> this reshape is tile-aligned (layout-preserving).
        basis2 = basis.reshape(inDim * nQ, tile_e)

        # One dense matmul against the block-diagonal control-point matrix.
        cpb = cp_ref[...].astype(jnp.float32)                  # (inDim*outDim, inDim*nQ)
        out = jnp.dot(
            cpb, basis2,
            preferred_element_type=jnp.float32,
            precision=lax.Precision.HIGHEST,
        )                                                      # (inDim*outDim, tile_e)
        o_ref[0] = out.astype(o_ref.dtype)

    return kernel


@functools.partial(jax.jit, static_argnames=("nCps", "k"))
def batched_bsplines(x, cp, *, nCps: int, k: int):
    """Pallas TPU implementation of BatchedBSplines.forward."""
    B, inDim, nEval = x.shape
    inDim2, outDim, nCps_ = cp.shape
    assert inDim2 == inDim and nCps_ == nCps

    nCpsPad = nCps + k - 1
    nQ = _round_up(nCpsPad, 8)      # sublane-aligned padded control-point axis

    # Fold B into the lane axis when nEval is small: dense lanes instead of
    # per-batch 128-lane padding + tiny grid steps.
    fold_b = (nEval < 512) and (B > 1)
    if fold_b:
        x_work = jnp.transpose(x, (1, 0, 2)).reshape(1, inDim, B * nEval)
        Bw, nE = 1, B * nEval
    else:
        x_work, Bw, nE = x, B, nEval

    LANE = 128
    nEvalPad = _round_up(nE, LANE)

    # paddedCp = cat([cp] + (k-1)*[cp[..., -1:]], dim=-1), zero-extended to nQ,
    # then laid out block-diagonally over inDim:
    #   cp_block[i*outDim + o, i2*nQ + q] = paddedCp[i, o, q] * (i == i2)
    cp_pad = jnp.concatenate([cp] + (k - 1) * [cp[..., -1:]], axis=-1)
    cp_pad = jnp.pad(cp_pad, ((0, 0), (0, 0), (0, nQ - nCpsPad)))
    eye = jnp.eye(inDim, dtype=cp.dtype)
    cp_block = (cp_pad[:, :, None, :] * eye[:, None, :, None]).reshape(
        inDim * outDim, inDim * nQ)

    # --- lane-tile selection: VMEM-budget-driven, multiple of 128, divides nEvalPad,
    #     keeps >= 4 grid steps when the problem is big enough (v7x dual TC). ---
    bytes_per_lane = 4 * (2 * inDim                 # x block, double-buffered
                          + 2 * inDim * outDim      # out block, double-buffered
                          + 3 * inDim * nQ          # basis (f32) + d (i32) + temp
                          + 4 * (k + 2) * inDim)    # de Boor coef / alpha temporaries
    fixed_bytes = 2 * cp_block.size * 4             # resident cp block (double-buffered)
    budget = 20 * 1024 * 1024
    n_lane_tiles = nEvalPad // LANE
    tile_e = LANE
    for mult in range(n_lane_tiles, 0, -1):
        if n_lane_tiles % mult:
            continue
        te = mult * LANE
        if te > 8192:
            continue
        if fixed_bytes + bytes_per_lane * te > budget:
            continue
        steps = Bw * (nEvalPad // te)
        if steps < 4 and Bw * n_lane_tiles >= 4:
            continue
        tile_e = te
        break

    x_in = (jnp.pad(x_work, ((0, 0), (0, 0), (0, nEvalPad - nE)))
            if nEvalPad != nE else x_work)

    kernel = _make_kernel(nCps, k, nQ)

    out = pl.pallas_call(
        kernel,
        out_shape=jax.ShapeDtypeStruct((Bw, inDim * outDim, nEvalPad), x.dtype),
        grid=(Bw, nEvalPad // tile_e),
        in_specs=[
            pl.BlockSpec((1, inDim, tile_e), lambda b, e: (b, 0, e)),        # x tile
            pl.BlockSpec((inDim * outDim, inDim * nQ), lambda b, e: (0, 0)),  # cp (resident)
        ],
        out_specs=pl.BlockSpec((1, inDim * outDim, tile_e), lambda b, e: (b, 0, e)),
        compiler_params=pltpu.CompilerParams(
            dimension_semantics=("parallel", "parallel"),
            vmem_limit_bytes=32 * 1024 * 1024,
        ),
    )(x_in, cp_block)

    # Reassemble (B, inDim, outDim, nEval).  Leading-dim reshapes are free; only the
    # B-fold path needs a transpose, and a slice only when nE isn't 128-aligned.
    if fold_b:
        out = out[..., :nE] if nEvalPad != nE else out
        out = out.reshape(inDim, outDim, B, nEval)
        out = jnp.transpose(out, (2, 0, 1, 3))
    else:
        out = out.reshape(Bw, inDim, outDim, nEvalPad)
        out = out[..., :nEval] if nEvalPad != nEval else out
    return out


def reference_forward(x, cp, *, nCps: int, k: int):
    """Plain-JAX transcription of the PyTorch forward (for verification)."""
    m = nCps - 1
    dx = 2.0 / (m - 1)
    t = jnp.linspace(-1.0 - k * dx, 1.0 + k * dx, m + 2 * k, dtype=jnp.float32)
    B, inDim, nEval = x.shape
    outDim = cp.shape[1]
    nCpsPad = nCps + k - 1

    paddedCp = jnp.concatenate([cp] + (k - 1) * [cp[..., -1:]], axis=-1)
    paddedCp = jnp.broadcast_to(paddedCp[None], (B, inDim, outDim, nCpsPad))

    xc = jnp.clip(x, -1.0, 1.0)
    left = jnp.argmax((t[None, None, None, :] > xc[..., None]).astype(jnp.float32), axis=-1) - 1
    idx = left[..., None] + jnp.arange(-k, 1)                               # (B, inDim, nEval, k+1)
    idx = jnp.broadcast_to(idx[:, :, None], (B, inDim, outDim, nEval, k + 1))
    padded_b = jnp.broadcast_to(paddedCp[..., None, :], (B, inDim, outDim, nEval, nCpsPad))
    d = jnp.take_along_axis(padded_b, idx, axis=-1)                         # (B, inDim, outDim, nEval, k+1)

    for r in range(1, k + 1):
        for j in range(k, r - 1, -1):
            alpha = (x - t[j + left - k]) / (t[j + 1 + left - r] - t[j + left - k])
            alpha = alpha[:, :, None, :]                                    # (B, inDim, 1, nEval)
            d = d.at[..., j].set((1.0 - alpha) * d[..., j - 1] + alpha * d[..., j])
    return d[..., k]


if __name__ == "__main__":
    B, inDim, outDim, nEval = 2, 4, 8, 16
    nCps, k = 8, 3

    key = jax.random.PRNGKey(0)
    kx, kc = jax.random.split(key)
    # keep x strictly inside (-1, 1) to avoid float-boundary knot ties
    x = jax.random.uniform(kx, (B, inDim, nEval), dtype=jnp.float32, minval=-0.9, maxval=0.9)
    cp = jax.random.normal(kc, (inDim, outDim, nCps), dtype=jnp.float32)

    out = batched_bsplines(x, cp, nCps=nCps, k=k)
    out = jax.block_until_ready(out)

    ref = reference_forward(x, cp, nCps=nCps, k=k)
    assert out.shape == (B, inDim, outDim, nEval), out.shape
    assert jnp.allclose(out, ref, rtol=1e-4, atol=1e-5), float(jnp.max(jnp.abs(out - ref)))

    print("KERNEL_OK")
</pallas_src>

<mosaic_0001>
module attributes {stable_mosaic.version = 11 : i64} {
  func.func @kernel(%arg0: i32, %arg1: i32, %arg2: memref<1x4x128xf32, #tpu.memory_space<vmem>>, %arg3: memref<32x64xf32, #tpu.memory_space<vmem>>, %arg4: memref<1x32x128xf32, #tpu.memory_space<vmem>>) attributes {dimension_semantics = [#tpu.dimension_semantics<parallel>, #tpu.dimension_semantics<parallel>], iteration_bounds = array<i64: 1, 1>, scalar_prefetch = 0 : i64, scratch_operands = 0 : i64, tpu.core_type = #tpu.core_type<tc>, window_params = [{transform_indices = @transform_0, window_bounds = array<i64: 1, 4, 128>}, {pipeline_mode = #tpu.pipeline_mode<synchronous>, transform_indices = @transform_1, window_bounds = array<i64: 32, 64>}, {transform_indices = @transform_2, window_bounds = array<i64: 1, 32, 128>}]} {
    %c0 = arith.constant 0 : index
    %c0_0 = arith.constant 0 : index
    %c0_1 = arith.constant 0 : index
    %0 = vector.load %arg2[%c0, %c0_0, %c0_1] : memref<1x4x128xf32, #tpu.memory_space<vmem>>, vector<1x4x128xf32>
    %1 = vector.shape_cast %0 : vector<1x4x128xf32> to vector<4x128xf32>
    %cst = arith.constant -1.000000e+00 : f32
    %cst_2 = arith.constant 1.000000e+00 : f32
    %2 = vector.broadcast %cst : f32 to vector<4x128xf32>
    %3 = arith.maximumf %2, %1 : vector<4x128xf32>
    %4 = vector.broadcast %cst_2 : f32 to vector<4x128xf32>
    %5 = arith.minimumf %4, %3 : vector<4x128xf32>
    %cst_3 = arith.constant -2.000000e+00 : f32
    %6 = vector.broadcast %cst_3 : f32 to vector<4x128xf32>
    %7 = arith.subf %5, %6 : vector<4x128xf32>
    %cst_4 = arith.constant 3.000000e+00 : f32
    %8 = vector.broadcast %cst_4 : f32 to vector<4x128xf32>
    %9 = arith.mulf %7, %8 : vector<4x128xf32>
    %10 = math.floor %9 : vector<4x128xf32>
    %11 = arith.fptosi %10 : vector<4x128xf32> to vector<4x128xi32>
    %c3_i32 = arith.constant 3 : i32
    %c9_i32 = arith.constant 9 : i32
    %12 = vector.broadcast %c3_i32 : i32 to vector<4x128xi32>
    %13 = arith.maxsi %12, %11 : vector<4x128xi32>
    %14 = vector.broadcast %c9_i32 : i32 to vector<4x128xi32>
    %15 = arith.minsi %14, %13 : vector<4x128xi32>
    %cst_5 = arith.constant -2.000000e+00 : f32
    %16 = vector.broadcast %cst_5 : f32 to vector<4x128xf32>
    %17 = arith.subf %1, %16 : vector<4x128xf32>
    %cst_6 = arith.constant 3.000000e+00 : f32
    %18 = vector.broadcast %cst_6 : f32 to vector<4x128xf32>
    %19 = arith.mulf %17, %18 : vector<4x128xf32>
    %20 = arith.sitofp %15 : vector<4x128xi32> to vector<4x128xf32>
    %21 = arith.subf %19, %20 : vector<4x128xf32>
    %cst_7 = arith.constant 0.000000e+00 : f32
    %22 = vector.broadcast %cst_7 : f32 to vector<4x128xf32>
    %23 = arith.subf %21, %22 : vector<4x128xf32>
    %cst_8 = arith.constant 0.333333343 : f32
    %24 = vector.broadcast %cst_8 : f32 to vector<4x128xf32>
    %25 = arith.mulf %23, %24 : vector<4x128xf32>
    %cst_9 = arith.constant 1.000000e+00 : f32
    %26 = vector.broadcast %cst_9 : f32 to vector<4x128xf32>
    %27 = arith.subf %26, %25 : vector<4x128xf32>
    %cst_10 = arith.constant -1.000000e+00 : f32
    %28 = vector.broadcast %cst_10 : f32 to vector<4x128xf32>
    %29 = arith.subf %21, %28 : vector<4x128xf32>
    %cst_11 = arith.constant 0.333333343 : f32
    %30 = vector.broadcast %cst_11 : f32 to vector<4x128xf32>
    %31 = arith.mulf %29, %30 : vector<4x128xf32>
    %cst_12 = arith.constant 1.000000e+00 : f32
    %32 = vector.broadcast %cst_12 : f32 to vector<4x128xf32>
    %33 = arith.subf %32, %31 : vector<4x128xf32>
    %cst_13 = arith.constant -2.000000e+00 : f32
    %34 = vector.broadcast %cst_13 : f32 to vector<4x128xf32>
    %35 = arith.subf %21, %34 : vector<4x128xf32>
    %cst_14 = arith.constant 0.333333343 : f32
    %36 = vector.broadcast %cst_14 : f32 to vector<4x128xf32>
    %37 = arith.mulf %35, %36 : vector<4x128xf32>
    %cst_15 = arith.constant 1.000000e+00 : f32
    %38 = vector.broadcast %cst_15 : f32 to vector<4x128xf32>
    %39 = arith.subf %38, %37 : vector<4x128xf32>
    %cst_16 = arith.constant 0.000000e+00 : f32
    %40 = vector.broadcast %cst_16 : f32 to vector<4x128xf32>
    %41 = arith.subf %21, %40 : vector<4x128xf32>
    %cst_17 = arith.constant 5.000000e-01 : f32
    %42 = vector.broadcast %cst_17 : f32 to vector<4x128xf32>
    %43 = arith.mulf %41, %42 : vector<4x128xf32>
    %cst_18 = arith.constant 1.000000e+00 : f32
    %44 = vector.broadcast %cst_18 : f32 to vector<4x128xf32>
    %45 = arith.subf %44, %43 : vector<4x128xf32>
    %46 = arith.mulf %45, %33 : vector<4x128xf32>
    %47 = arith.mulf %45, %31 : vector<4x128xf32>
    %48 = arith.mulf %43, %27 : vector<4x128xf32>
    %49 = arith.addf %47, %48 : vector<4x128xf32>
    %50 = arith.mulf %43, %25 : vector<4x128xf32>
    %cst_19 = arith.constant -1.000000e+00 : f32
    %51 = vector.broadcast %cst_19 : f32 to vector<4x128xf32>
    %52 = arith.subf %21, %51 : vector<4x128xf32>
    %cst_20 = arith.constant 5.000000e-01 : f32
    %53 = vector.broadcast %cst_20 : f32 to vector<4x128xf32>
    %54 = arith.mulf %52, %53 : vector<4x128xf32>
    %cst_21 = arith.constant 1.000000e+00 : f32
    %55 = vector.broadcast %cst_21 : f32 to vector<4x128xf32>
    %56 = arith.subf %55, %54 : vector<4x128xf32>
    %57 = arith.mulf %56, %39 : vector<4x128xf32>
    %58 = arith.mulf %56, %37 : vector<4x128xf32>
    %59 = arith.mulf %54, %33 : vector<4x128xf32>
    %60 = arith.addf %58, %59 : vector<4x128xf32>
    %61 = arith.mulf %54, %31 : vector<4x128xf32>
    %cst_22 = arith.constant 0.000000e+00 : f32
    %62 = vector.broadcast %cst_22 : f32 to vector<4x128xf32>
    %63 = arith.subf %21, %62 : vector<4x128xf32>
    %cst_23 = arith.constant 1.000000e+00 : f32
    %64 = vector.broadcast %cst_23 : f32 to vector<4x128xf32>
    %65 = arith.mulf %63, %64 : vector<4x128xf32>
    %cst_24 = arith.constant 1.000000e+00 : f32
    %66 = vector.broadcast %cst_24 : f32 to vector<4x128xf32>
    %67 = arith.subf %66, %65 : vector<4x128xf32>
    %68 = arith.mulf %67, %57 : vector<4x128xf32>
    %69 = arith.mulf %67, %60 : vector<4x128xf32>
    %70 = arith.mulf %65, %46 : vector<4x128xf32>
    %71 = arith.addf %69, %70 : vector<4x128xf32>
    %72 = arith.mulf %67, %61 : vector<4x128xf32>
    %73 = arith.mulf %65, %49 : vector<4x128xf32>
    %74 = arith.addf %72, %73 : vector<4x128xf32>
    %75 = arith.mulf %65, %50 : vector<4x128xf32>
    %76 = tpu.iota {dimensions = array<i32: 1>} : vector<1x16x1xi32>
    %77 = vector.shape_cast %15 : vector<4x128xi32> to vector<4x1x128xi32>
    %78 = vector.broadcast %76 : vector<1x16x1xi32> to vector<4x16x128xi32>
    %79 = vector.broadcast %77 : vector<4x1x128xi32> to vector<4x16x128xi32>
    %80 = arith.subi %78, %79 : vector<4x16x128xi32>
    %c3_i32_25 = arith.constant 3 : i32
    %81 = vector.broadcast %c3_i32_25 : i32 to vector<4x16x128xi32>
    %82 = arith.addi %80, %81 : vector<4x16x128xi32>
    %83 = vector.shape_cast %68 : vector<4x128xf32> to vector<4x1x128xf32>
    %c0_i32 = arith.constant 0 : i32
    %84 = vector.broadcast %c0_i32 : i32 to vector<4x16x128xi32>
    %85 = arith.cmpi eq, %82, %84 : vector<4x16x128xi32>
    %cst_26 = arith.constant 0.000000e+00 : f32
    %86 = vector.shape_cast %83 : vector<4x1x128xf32> to vector<4x1x128xf32>
    %87 = vector.broadcast %86 : vector<4x1x128xf32> to vector<4x16x128xf32>
    %88 = vector.broadcast %cst_26 : f32 to vector<4x16x128xf32>
    %89 = arith.select %85, %87, %88 : vector<4x16x128xi1>, vector<4x16x128xf32>
    %90 = vector.shape_cast %71 : vector<4x128xf32> to vector<4x1x128xf32>
    %c1_i32 = arith.constant 1 : i32
    %91 = vector.broadcast %c1_i32 : i32 to vector<4x16x128xi32>
    %92 = arith.cmpi eq, %82, %91 : vector<4x16x128xi32>
    %93 = vector.shape_cast %90 : vector<4x1x128xf32> to vector<4x1x128xf32>
    %94 = vector.broadcast %93 : vector<4x1x128xf32> to vector<4x16x128xf32>
    %95 = arith.select %92, %94, %89 : vector<4x16x128xi1>, vector<4x16x128xf32>
    %96 = vector.shape_cast %74 : vector<4x128xf32> to vector<4x1x128xf32>
    %c2_i32 = arith.constant 2 : i32
    %97 = vector.broadcast %c2_i32 : i32 to vector<4x16x128xi32>
    %98 = arith.cmpi eq, %82, %97 : vector<4x16x128xi32>
    %99 = vector.shape_cast %96 : vector<4x1x128xf32> to vector<4x1x128xf32>
    %100 = vector.broadcast %99 : vector<4x1x128xf32> to vector<4x16x128xf32>
    %101 = arith.select %98, %100, %95 : vector<4x16x128xi1>, vector<4x16x128xf32>
    %102 = vector.shape_cast %75 : vector<4x128xf32> to vector<4x1x128xf32>
    %c3_i32_27 = arith.constant 3 : i32
    %103 = vector.broadcast %c3_i32_27 : i32 to vector<4x16x128xi32>
    %104 = arith.cmpi eq, %82, %103 : vector<4x16x128xi32>
    %105 = vector.shape_cast %102 : vector<4x1x128xf32> to vector<4x1x128xf32>
    %106 = vector.broadcast %105 : vector<4x1x128xf32> to vector<4x16x128xf32>
    %107 = arith.select %104, %106, %101 : vector<4x16x128xi1>, vector<4x16x128xf32>
    %108 = vector.shape_cast %107 : vector<4x16x128xf32> to vector<64x128xf32>
    %c0_28 = arith.constant 0 : index
    %c0_29 = arith.constant 0 : index
    %109 = vector.load %arg3[%c0_28, %c0_29] : memref<32x64xf32, #tpu.memory_space<vmem>>, vector<32x64xf32>
    %cst_30 = arith.constant dense<0.000000e+00> : vector<32x128xf32>
    %110 = tpu.matmul %109, %108, %cst_30 {dimension_numbers = #tpu.dot_dimension_numbers<[1], [0], [0], [1], [0, 0, 1, 1], [], []>, precision = #tpu.contract_precision<fp32>} : vector<32x64xf32>, vector<64x128xf32>, vector<32x128xf32> -> vector<32x128xf32>
    %c0_31 = arith.constant 0 : index
    %c0_32 = arith.constant 0 : index
    %c0_33 = arith.constant 0 : index
    %111 = vector.load %arg4[%c0_31, %c0_32, %c0_33] : memref<1x32x128xf32, #tpu.memory_space<vmem>>, vector<1x32x128xf32>
    %112 = vector.shape_cast %111 : vector<1x32x128xf32> to vector<32x128xf32>
    %113 = vector.shape_cast %110 : vector<32x128xf32> to vector<1x32x128xf32>
    tpu.vector_store %arg4[%c0_31, %c0_32, %c0_33], %113 {strides = array<i32>} : memref<1x32x128xf32, #tpu.memory_space<vmem>>, vector<1x32x128xf32>,
    return
  }
  func.func @transform_0(%arg0: i32, %arg1: i32) -> (i32, i32, i32) {
    %c0_i32 = arith.constant 0 : i32
    %c0_i32_0 = arith.constant 0 : i32
    return %arg0, %c0_i32, %arg1 : i32, i32, i32
  }
  func.func @transform_1(%arg0: i32, %arg1: i32) -> (i32, i32) {
    %c0_i32 = arith.constant 0 : i32
    %c0_i32_0 = arith.constant 0 : i32
    %c0_i32_1 = arith.constant 0 : i32
    return %c0_i32, %c0_i32_0 : i32, i32
  }
  func.func @transform_2(%arg0: i32, %arg1: i32) -> (i32, i32, i32) {
    %c0_i32 = arith.constant 0 : i32
    %c0_i32_0 = arith.constant 0 : i32
    return %arg0, %c0_i32, %arg1 : i32, i32, i32
  }
}

</mosaic_0001>

<bundles_post_ra>
// kernel: batched_bsplines.1
= control target key start
LH: loop header
LB: loop body
LE: loop exit
PB: predicated region body
PF: predicated region fallthrough
CT: control target
= control target key end

     0   :  { %vm364_vm0 = vcmask 523264   ;;  %v57_v10 = vlaneseq  ;;  %v1379_v13 = vmov 1966171168   ;;  %s1705_s0 = inlined_call_operand.vmem [shape: f32[1,4,128], index: 0, kind: input, shape index: {}]   ;;  %s1706_s1 = inlined_call_operand.vmem [shape: f32[32,64], index: 1, kind: input, shape index: {}]   ;;  %s1707_s2 = inlined_call_operand.vmem [shape: f32[1,32,128], index: 2, kind: output, shape index: {}]  }
   0x1   :  { %v11_v0 = vld [vmem:[%s1705_s0] sm:$0xf]  ;;  %v362_v4 = vld [vmem:[%s1706_s1 + $0x10] sm:$0xff]  ;;  %v361_v6 = vld [vmem:[%s1706_s1 + $0x8] sm:$0xff]  ;;  %v61_v14 = vunpack.c.l.s4 %v1379_v13 }
   0x2   :  { %v360_v1 = vld [vmem:[%s1706_s1] sm:$0xff]  ;;  %v1051_v2 = vclamps-f32 %v11_v0, 1.0  ;;  %v372_v7 = vsel %vm364_vm0, %v362_v4, 0  ;;  %v363_v8 = vld [vmem:[%s1706_s1 + $0x18] sm:$0xff]  ;;  %v369_v15 = vsel %vm364_vm0, %v361_v6, 0  ;;  %v1423_v22 = vshrl.u32 %v57_v10, 7 }
   0x3   :  { %v366_v3 = vsel %vm364_vm0, %v360_v1, 0  ;;  %v375_v16 = vsel %vm364_vm0, %v363_v8, 0  ;;  %v1421_v20 = vand.u32 4294901760, %v369_v15  ;;  %v62_v23 = vunpack.c.0.s8 %v61_v14 }
   0x4   :  { %v1405_v5 = vand.u32 4294901760, %v366_v3  ;;  %v1052_v9 = vadd.f32 2.0, %v1051_v2  ;;  %v1425_v25 = vand.u32 4294901760, %v372_v7  ;;  %v1053_v27 = vadd.f32 2.0, %v11_v0 }
   0x5   :  { %v1428_v28 = vsub.f32 %v369_v15, %v1421_v20  ;;  %v1431_v29 = vsub.s32 %v62_v23, %v1423_v22  ;;  %v1437_v35 = vand.u32 4294901760, %v375_v16  ;;  %v1441_v38 = vsub.s32 0, %v1423_v22 }
   0x6   :  { %v1415_v11 = vsub.f32 %v366_v3, %v1405_v5  ;;  %v15_v12 = vmul.f32 3.0, %v1052_v9  ;;  %v1434_v31 = vsub.f32 %v372_v7, %v1425_v25  ;;  %v23_v32 = vmul.f32 3.0, %v1053_v27 }
   0x7   :  { %v462_v34 = vand.u32 4294901760, %v1428_v28  ;;  %v1446_v42 = vadd.s32 8, %v1423_v22  ;;  %v1454_v44 = vsub.f32 %v375_v16, %v1437_v35 }
   0x8   :  { %v452_v17 = vand.u32 4294901760, %v1415_v11  ;;  %v16_v18 = vfloor.f32 %v15_v12  ;;  %v472_v39 = vand.u32 4294901760, %v1434_v31 }
   0x9   :  { %v1451_v43 = vsub.f32 %v1428_v28, %v462_v34 }
   0xa   :  { %v453_v19 = vsub.f32 %v1415_v11, %v452_v17  ;;  %1210 = vmatprep.mubr.f32.mxu0 %v452_v17  ;;  %v1376_v21 = vtrunc.f32 %v16_v18  ;;  %v1460_v52 = vsub.f32 %v1434_v31, %v472_v39  ;;  %v482_v17 = vand.u32 4294901760, %v1454_v44 }
   0xc   :  { %v454_v24 = vand.u32 4294901760, %v453_v19  ;;  %v1377_v26 = vcvt.f32.s32 %v1376_v21 }
   0xe   :  { %1144 = vmatprep.mubr.f32.mxu1 %v454_v24  ;;  %vm18_vm1 = vcmp.gt.s32.totalorder %v1377_v26, 3 }
   0xf   :  { %v19_v30 = vsel %vm18_vm1, %v1377_v26, 3 }
  0x10   :  { %vm20_vm2 = vcmp.lt.s32.totalorder %v19_v30, 9 }
  0x11   :  { %v21_v33 = vsel %vm20_vm2, %v19_v30, 9 }
  0x12   :  { %v24_v36 = vcvt.s32.f32 %v21_v33  ;;  %v66_v37 = vrot.slane %v21_v33, %v1431_v29 }
  0x14   :  { %v25_v40 = vsub.f32 %v23_v32, %v24_v36  ;;  %v74_v41 = vrot.slane %v66_v37, %v1431_v29  ;;  %v67_v51 = vcombine.high %v66_v37, %v66_v37 }
  0x16   :  { %v26_v45 = vmul.f32 0.33333334, %v25_v40  ;;  %v1054_v46 = vadd.f32 1.0, %v25_v40  ;;  %v1055_v47 = vadd.f32 2.0, %v25_v40  ;;  %v34_v48 = vmul.f32 0.5, %v25_v40 }
  0x17   :  { %v48_v49 = vsub.f32 1.0, %v25_v40  ;;  %v87_v50 = vrot.slane %v74_v41, %v1441_v38  ;;  %v1469_v14 = vrot.slane %v67_v51, %v1431_v29  ;;  %v82_v16 = vcombine.high %v74_v41, %v74_v41 }
  0x18   :  { %v27_v53 = vsub.f32 1.0, %v26_v45  ;;  %v29_v54 = vmul.f32 0.33333334, %v1054_v46  ;;  %v32_v55 = vmul.f32 0.33333334, %v1055_v47  ;;  %v35_v56 = vsub.f32 1.0, %v34_v48 }
  0x19   :  { %v40_v57 = vmul.f32 %v34_v48, %v26_v45  ;;  %v41_v58 = vmul.f32 0.5, %v1054_v46  ;;  %v100_v59 = vsub.s32 %v1423_v22, %v87_v50  ;;  %v101_v60 = vsub.s32 %v1446_v42, %v87_v50 }
  0x1a   :  { %v30_v61 = vsub.f32 1.0, %v29_v54  ;;  %v33_v62 = vsub.f32 1.0, %v32_v55  ;;  %v37_v63 = vmul.f32 %v35_v56, %v29_v54  ;;  %v38_v0 = vmul.f32 %v34_v48, %v27_v53 }
  0x1b   :  { %v42_v1 = vsub.f32 1.0, %v41_v58  ;;  %v47_v2 = vmul.f32 %v41_v58, %v29_v54  ;;  %v56_v3 = vmul.f32 %v40_v57, %v25_v40  ;;  %v1464_v4 = vadd.s32 3, %v100_v59 }
  0x1c   :  { %v36_v6 = vmul.f32 %v35_v56, %v30_v61  ;;  %v39_v7 = vadd.f32 %v38_v0, %v37_v63  ;;  %v45_v8 = vmul.f32 %v41_v58, %v30_v61  ;;  %v1466_v9 = vadd.s32 3, %v101_v60 }
  0x1d   :  { %v43_v10 = vmul.f32 %v42_v1, %v33_v62  ;;  %v44_v12 = vmul.f32 %v42_v1, %v32_v55  ;;  %v53_v13 = vmul.f32 %v48_v49, %v47_v2  ;;  %vm141_vm3 = vcmp.eq.s32.totalorder %v1464_v4, 0 }
  0x1e   :  { %v54_v15 = vmul.f32 %v39_v7, %v25_v40  ;;  %v51_v21 = vmul.f32 %v36_v6, %v25_v40  ;;  %vm142_vm4 = vcmp.eq.s32.totalorder %v1466_v9, 0  ;;  %vm202_vm5 = vcmp.eq.s32.totalorder %v1464_v4, 1 }
  0x1f   :  { %v46_v18 = vadd.f32 %v45_v8, %v44_v12  ;;  %v49_v19 = vmul.f32 %v48_v49, %v43_v10  ;;  %vm203_vm6 = vcmp.eq.s32.totalorder %v1466_v9, 1  ;;  %v306_v24 = vrot.slane %v56_v3, %v1431_v29 }
  0x20   :  { %v55_v23 = vadd.f32 %v54_v15, %v53_v13  ;;  %vm263_vm7 = vcmp.eq.s32.totalorder %v1464_v4, 2  ;;  %vm264_vm8 = vcmp.eq.s32.totalorder %v1466_v9, 2  ;;  %v91_v30 = vrot.slane %v1469_v14, %v1441_v38 }
  0x21   :  { %v50_v26 = vmul.f32 %v48_v49, %v46_v18  ;;  %v123_v27 = vrot.slane %v49_v19, %v1431_v29  ;;  %v1484_v33 = vrot.slane %v306_v24, %v1431_v29  ;;  %vm324_vm9 = vcmp.eq.s32.totalorder %v1464_v4, 3 }
  0x22   :  { %v245_v32 = vrot.slane %v55_v23, %v1431_v29  ;;  %vm325_vm10 = vcmp.eq.s32.totalorder %v1466_v9, 3  ;;  %v307_v36 = vcombine.high %v306_v24, %v306_v24  ;;  %v95_v37 = vrot.slane %v82_v16, %v1441_v38 }
  0x23   :  { %v52_v40 = vadd.f32 %v51_v21, %v50_v26  ;;  %v131_v41 = vrot.slane %v123_v27, %v1431_v29  ;;  %v102_v45 = vsub.s32 %v1423_v22, %v91_v30  ;;  %v103_v46 = vsub.s32 %v1446_v42, %v91_v30 }
  0x24   :  { %v1493_v47 = vrot.slane %v245_v32, %v1431_v29  ;;  %v335_v48 = vrot.slane %v1484_v33, %v1441_v38  ;;  %v124_v49 = vcombine.high %v123_v27, %v123_v27  ;;  %v246_v50 = vcombine.high %v245_v32, %v245_v32 }
  0x25   :  { %v152_v51 = vrot.slane %v131_v41, %v1441_v38  ;;  %v184_v53 = vrot.slane %v52_v40, %v1431_v29  ;;  %v110_v54 = vadd.s32 3, %v102_v45  ;;  %v111_v55 = vadd.s32 3, %v103_v46 }
  0x26   :  { %v274_v56 = vrot.slane %v1493_v47, %v1441_v38  ;;  %v1502_v57 = vrot.slane %v124_v49, %v1431_v29  ;;  %v1505_v58 = vrot.slane %v246_v50, %v1431_v29  ;;  %v1508_v59 = vrot.slane %v307_v36, %v1431_v29 }
  0x27   :  { %v169_v60 = vsel %vm141_vm3, %v152_v51, 0.0  ;;  %v170_v61 = vsel %vm142_vm4, %v152_v51, 0.0  ;;  %v192_v62 = vrot.slane %v184_v53, %v1431_v29  ;;  %vm143_vm11 = vcmp.eq.s32.totalorder %v110_v54, 0 }
  0x28   :  { %vm144_vm12 = vcmp.eq.s32.totalorder %v111_v55, 0  ;;  %v156_v63 = vrot.slane %v1502_v57, %v1441_v38  ;;  %v185_v0 = vcombine.high %v184_v53, %v184_v53  ;;  %vm204_vm13 = vcmp.eq.s32.totalorder %v110_v54, 1 }
  0x29   :  { %v213_v1 = vrot.slane %v192_v62, %v1441_v38  ;;  %vm205_vm14 = vcmp.eq.s32.totalorder %v111_v55, 1  ;;  %vm265_vm15 = vcmp.eq.s32.totalorder %v110_v54, 2  ;;  %vm266_vm0 = vcmp.eq.s32.totalorder %v111_v55, 2 }
  0x2a   :  { %v171_v2 = vsel %vm143_vm11, %v156_v63, 0.0  ;;  %v172_v3 = vsel %vm144_vm12, %v156_v63, 0.0  ;;  %v1519_v6 = vrot.slane %v185_v0, %v1431_v29  ;;  %v278_v7 = vrot.slane %v1505_v58, %v1441_v38 }
  0x2b   :  { %v230_v8 = vsel %vm202_vm5, %v213_v1, %v169_v60  ;;  %v231_v10 = vsel %vm203_vm6, %v213_v1, %v170_v61  ;;  %vm326_vm1 = vcmp.eq.s32.totalorder %v110_v54, 3  ;;  %vm327_vm2 = vcmp.eq.s32.totalorder %v111_v55, 3 }
  0x2c   :  { %v291_v12 = vsel %vm263_vm7, %v274_v56, %v230_v8  ;;  %v292_v13 = vsel %vm264_vm8, %v274_v56, %v231_v10  ;;  %v217_v29 = vrot.slane %v1519_v6, %v1441_v38  ;;  %v339_v15 = vrot.slane %v1508_v59, %v1441_v38 }
  0x2d   :  { %v1537_v16 = vsel %vm324_vm9, %v335_v48, %v291_v12  ;;  %v1541_v18 = vsel %vm325_vm10, %v335_v48, %v292_v13  ;;  %v104_v19 = vsub.s32 %v1423_v22, %v95_v37  ;;  %v105_v21 = vsub.s32 %v1446_v42, %v95_v37 }
  0x2e   :  { %v378_v23 = vand.u32 4294901760, %v1537_v16  ;;  %v381_v24 = vand.u32 4294901760, %v1541_v18  ;;  %v232_v26 = vsel %vm204_vm13, %v217_v29, %v171_v2  ;;  %v233_v27 = vsel %vm205_vm14, %v217_v29, %v172_v3 }
  0x2f   :  { %v293_v4 = vsel %vm265_vm15, %v278_v7, %v232_v26  ;;  %v294_v30 = vsel %vm266_vm0, %v278_v7, %v233_v27  ;;  %v112_v32 = vadd.s32 3, %v104_v19  ;;  %v113_v9 = vadd.s32 3, %v105_v21 }
  0x30   :  { %v1551_v36 = vpack.c.bf16 %v381_v24, %v378_v23  ;;  %v354_v40 = vsel %vm326_vm1, %v339_v15, %v293_v4  ;;  %v1555_v37 = vsel %vm327_vm2, %v339_v15, %v294_v30  ;;  %v139_v45 = vcombine.high %v131_v41, %v131_v41 }
  0x31   :  { %v384_v46 = vand.u32 4294901760, %v354_v40  ;;  %v387_v48 = vand.u32 4294901760, %v1555_v37  ;;  %vm145_vm3 = vcmp.eq.s32.totalorder %v112_v32, 0  ;;  %vm146_vm4 = vcmp.eq.s32.totalorder %v113_v9, 0 }
  0x32   :  { %1261 = vmatprep.subr.bf16.mxu1 %v1551_v36  ;;  %1309 = vmatprep.subr.bf16.mxu0 %v1551_v36  ;;  %v160_v49 = vrot.slane %v139_v45, %v1441_v38  ;;  %v200_v50 = vcombine.high %v192_v62, %v192_v62  ;;  %vm206_vm5 = vcmp.eq.s32.totalorder %v112_v32, 1  ;;  %vm207_vm6 = vcmp.eq.s32.totalorder %v113_v9, 1 }
  0x33   :  { %1263 = vmatpush3.bf16.msra.mxu1 %v1551_v36  ;;  %1311 = vmatpush3.bf16.msra.mxu0 %v1551_v36  ;;  %v1565_v41 = vpack.c.bf16 %v387_v48, %v384_v46  ;;  %v261_v51 = vcombine.high %v1493_v47, %v1493_v47  ;;  %vm267_vm7 = vcmp.eq.s32.totalorder %v112_v32, 2  ;;  %vm268_vm8 = vcmp.eq.s32.totalorder %v113_v9, 2 }
  0x34   :  { %v173_v53 = vsel %vm145_vm3, %v160_v49, 0.0  ;;  %v174_v54 = vsel %vm146_vm4, %v160_v49, 0.0  ;;  %v221_v55 = vrot.slane %v200_v50, %v1441_v38  ;;  %v322_v56 = vcombine.high %v1484_v33, %v1484_v33 }
  0x35   :  { %1265 = vmatprep.subr.bf16.mxu1 %v1565_v41  ;;  %1313 = vmatprep.subr.bf16.mxu0 %v1565_v41  ;;  %v282_v60 = vrot.slane %v261_v51, %v1441_v38  ;;  %vm328_vm9 = vcmp.eq.s32.totalorder %v112_v32, 3  ;;  %vm329_vm10 = vcmp.eq.s32.totalorder %v113_v9, 3  ;;  %v83_v47 = vcombine.high %v1469_v14, %v1469_v14 }
  0x36   :  { %v234_v61 = vsel %vm206_vm5, %v221_v55, %v173_v53  ;;  %v235_v62 = vsel %vm207_vm6, %v221_v55, %v174_v54  ;;  %v343_v63 = vrot.slane %v322_v56, %v1441_v38  ;;  %v140_v33 = vcombine.high %v1502_v57, %v1502_v57 }
  0x37   :  { %1267 = vmatpush3.bf16.msra.mxu1 %v1565_v41  ;;  %1315 = vmatpush3.bf16.msra.mxu0 %v1565_v41  ;;  %v295_v0 = vsel %vm267_vm7, %v282_v60, %v234_v61  ;;  %v296_v1 = vsel %vm268_vm8, %v282_v60, %v235_v62  ;;  %v99_v2 = vrot.slane %v83_v47, %v1441_v38  ;;  %v464_v14 = vand.u32 4294901760, %v1451_v43 }
  0x38   :  { %v356_v3 = vsel %vm328_vm9, %v343_v63, %v295_v0  ;;  %v357_v7 = vsel %vm329_vm10, %v343_v63, %v296_v1  ;;  %v164_v8 = vrot.slane %v140_v33, %v1441_v38  ;;  %v201_v10 = vcombine.high %v1519_v6, %v1519_v6 }
  0x39   :  { %v390_v57 = vand.u32 4294901760, %v356_v3  ;;  %v393_v12 = vand.u32 4294901760, %v357_v7  ;;  %v106_v13 = vsub.s32 %v1423_v22, %v99_v2  ;;  %v107_v29 = vsub.s32 %v1446_v42, %v99_v2 }
  0x3a   :  { %v225_v15 = vrot.slane %v201_v10, %v1441_v38  ;;  %v262_v19 = vcombine.high %v1505_v58, %v1505_v58  ;;  %v323_v21 = vcombine.high %v1508_v59, %v1508_v59  ;;  %v1599_v26 = vsub.f32 %v1537_v16, %v378_v23 }
  0x3b   :  { %v1601_v27 = vpack.c.bf16 %v393_v12, %v390_v57  ;;  %v114_v6 = vadd.s32 3, %v106_v13  ;;  %v115_v4 = vadd.s32 3, %v107_v29  ;;  %v1604_v30 = vsub.f32 %v1541_v18, %v381_v24 }
  0x3c   :  { %v286_v22 = vrot.slane %v262_v19, %v1441_v38  ;;  %v347_v42 = vrot.slane %v323_v21, %v1441_v38  ;;  %v493_v32 = vand.u32 4294901760, %v1599_v26  ;;  %v1609_v58 = vsub.f32 %v354_v40, %v384_v46 }
  0x3d   :  { %1269 = vmatprep.subr.bf16.mxu1 %v1601_v27  ;;  %1317 = vmatprep.subr.bf16.mxu0 %v1601_v27  ;;  %vm147_vm11 = vcmp.eq.s32.totalorder %v114_v6, 0  ;;  %vm148_vm12 = vcmp.eq.s32.totalorder %v115_v4, 0  ;;  %vm208_vm13 = vcmp.eq.s32.totalorder %v114_v6, 1  ;;  %vm209_vm14 = vcmp.eq.s32.totalorder %v115_v4, 1 }
  0x3e   :  { %1271 = vmatpush3.bf16.msra.mxu1 %v1601_v27  ;;  %1319 = vmatpush3.bf16.msra.mxu0 %v1601_v27  ;;  %v175_v59 = vsel %vm147_vm11, %v164_v8, 0.0  ;;  %v176_v16 = vsel %vm148_vm12, %v164_v8, 0.0  ;;  %vm269_vm15 = vcmp.eq.s32.totalorder %v114_v6, 2  ;;  %vm270_vm0 = vcmp.eq.s32.totalorder %v115_v4, 2 }
  0x3f   :  { %v236_v38 = vsel %vm208_vm13, %v225_v15, %v175_v59  ;;  %v237_v18 = vsel %vm209_vm14, %v225_v15, %v176_v16  ;;  %vm330_vm1 = vcmp.eq.s32.totalorder %v114_v6, 3  ;;  %vm331_vm2 = vcmp.eq.s32.totalorder %v115_v4, 3 }
  0x40   :  { %v297_v23 = vsel %vm269_vm15, %v286_v22, %v236_v38  ;;  %v298_v24 = vsel %vm270_vm0, %v286_v22, %v237_v18  ;;  %v494_v9 = vsub.f32 %v1599_v26, %v493_v32  ;;  %v500_v40 = vand.u32 4294901760, %v1604_v30 }
  0x41   :  { %v358_v45 = vsel %vm330_vm1, %v347_v42, %v297_v23  ;;  %v359_v46 = vsel %vm331_vm2, %v347_v42, %v298_v24  ;;  %v507_v49 = vand.u32 4294901760, %v1609_v58  ;;  %v1621_v50 = vsub.f32 %v1555_v37, %v387_v48 }
  0x42   :  { %v396_v51 = vand.u32 4294901760, %v358_v45  ;;  %v399_v53 = vand.u32 4294901760, %v359_v46  ;;  %v495_v54 = vand.u32 4294901760, %v494_v9  ;;  %v501_v55 = vsub.f32 %v1604_v30, %v500_v40 }
  0x43   :  { %v1324_v56 = vpack.c.bf16 %v500_v40, %v493_v32  ;;  %v508_v60 = vsub.f32 %v1609_v58, %v507_v49  ;;  %v514_v47 = vand.u32 4294901760, %v1621_v50  ;;  %v1626_v61 = vsub.f32 %v356_v3, %v390_v57 }
  0x44   :  { %v1628_v62 = vpack.c.bf16 %v399_v53, %v396_v51  ;;  %v502_v63 = vand.u32 4294901760, %v501_v55  ;;  %v1630_v33 = vsub.f32 %v357_v7, %v393_v12  ;;  %v1632_v0 = vsub.f32 %v358_v45, %v396_v51 }
  0x45   :  { %v509_v37 = vand.u32 4294901760, %v508_v60  ;;  %v515_v48 = vsub.f32 %v1621_v50, %v514_v47  ;;  %v521_v1 = vand.u32 4294901760, %v1626_v61  ;;  %v483_v2 = vsub.f32 %v1454_v44, %v482_v17 }
  0x46   :  { %1273 = vmatprep.subr.bf16.mxu1 %v1628_v62  ;;  %1321 = vmatprep.subr.bf16.mxu0 %v1628_v62  ;;  %v1276_v3 = vpack.c.bf16 %v502_v63, %v495_v54  ;;  %v528_v8 = vand.u32 4294901760, %v1630_v33  ;;  %v535_v7 = vand.u32 4294901760, %v1632_v0  ;;  %v1643_v10 = vsub.f32 %v359_v46, %v399_v53 }
  0x47   :  { %1275 = vmatpush3.bf16.msra.mxu1 %v1628_v62  ;;  %1323 = vmatpush3.bf16.msra.mxu0 %v1628_v62  ;;  %v516_v57 = vand.u32 4294901760, %v515_v48  ;;  %v522_v12 = vsub.f32 %v1626_v61, %v521_v1  ;;  %v1328_v13 = vpack.c.bf16 %v514_v47, %v507_v49  ;;  %v474_v4 = vand.u32 4294901760, %v1460_v52 }
  0x48   :  { %1277 = vmatprep.subr.bf16.mxu1 %v1276_v3  ;;  %1325 = vmatprep.subr.bf16.mxu0 %v1324_v56  ;;  %v529_v29 = vsub.f32 %v1630_v33, %v528_v8  ;;  %v536_v15 = vsub.f32 %v1632_v0, %v535_v7  ;;  %v542_v19 = vand.u32 4294901760, %v1643_v10  ;;  %v484_v32 = vand.u32 4294901760, %v483_v2 }
  0x49   :  { %v1280_v21 = vpack.c.bf16 %v516_v57, %v509_v37  ;;  %v523_v6 = vand.u32 4294901760, %v522_v12  ;;  %v1332_v16 = vpack.c.bf16 %v528_v8, %v521_v1  ;;  %v1296_v52 = vpack.c.bf16 %v1621_v50, %v1609_v58 }
  0x4a   :  { %1145 = vmatmul.mubr.f32.vlgmr.msra.gmra.mrb[0].mxu1 %v464_v14  ;;  %1211 = vmatmul.mubr.f32.vlgmr.msra.gmra.mrb[0].mxu0 %v462_v34  ;;  %v530_v22 = vand.u32 4294901760, %v529_v29  ;;  %v543_v42 = vsub.f32 %v1643_v10, %v542_v19  ;;  %v537_v38 = vand.u32 4294901760, %v536_v15  ;;  %v1336_v43 = vpack.c.bf16 %v542_v19, %v535_v7 }
  0x4b   :  { %1279 = vmatpush3.bf16.msra.mxu1 %v1276_v3  ;;  %1327 = vmatpush3.bf16.msra.mxu0 %v1324_v56 }
  0x4c   :  { %1281 = vmatprep.subr.bf16.mxu1 %v1280_v21  ;;  %1329 = vmatprep.subr.bf16.mxu0 %v1328_v13  ;;  %v1284_v59 = vpack.c.bf16 %v530_v22, %v523_v6  ;;  %v544_v18 = vand.u32 4294901760, %v543_v42 }
  0x4d   :  { %1147 = vmatprep.mubr.f32.mxu1 %v474_v4  ;;  %1213 = vmatprep.mubr.f32.mxu0 %v472_v39  ;;  %v1292_v39 = vpack.c.bf16 %v1604_v30, %v1599_v26 }
  0x4e   :  { %1148 = vmatmul.mubr.f32.gmra.mrb[2].mxu1 %v484_v32  ;;  %1214 = vmatmul.mubr.f32.gmra.mrb[2].mxu0 %v482_v17  ;;  %v1288_v34 = vpack.c.bf16 %v544_v18, %v537_v38  ;;  %v1300_v17 = vpack.c.bf16 %v1630_v33, %v1626_v61 }
  0x4f   :  { %1283 = vmatpush3.bf16.msra.mxu1 %v1280_v21  ;;  %1331 = vmatpush3.bf16.msra.mxu0 %v1328_v13 }
  0x50   :  { %1285 = vmatprep.subr.bf16.mxu1 %v1284_v59  ;;  %1333 = vmatprep.subr.bf16.mxu0 %v1332_v16 }
  0x51   :  { %1166 = vmatprep.mubr.f32.mxu1 %v1405_v5  ;;  %1232 = vmatprep.mubr.f32.mxu0 %v1405_v5 }
  0x53   :  { %1287 = vmatpush3.bf16.msra.mxu1 %v1284_v59  ;;  %1335 = vmatpush3.bf16.msra.mxu0 %v1332_v16 }
  0x54   :  { %1289 = vmatprep.subr.bf16.mxu1 %v1288_v34  ;;  %1337 = vmatprep.subr.bf16.mxu0 %v1336_v43 }
  0x57   :  { %1291 = vmatpush3.bf16.msra.mxu1 %v1288_v34  ;;  %1339 = vmatpush3.bf16.msra.mxu0 %v1336_v43 }
  0x58   :  { %1293 = vmatprep.subr.bf16.mxu1 %v1292_v39  ;;  %1341 = vmatprep.subr.bf16.mxu0 %v1551_v36 }
  0x5a   :  { %1167 = vmatmul.mubr.f32.vlgmr.msra.gmra.mrb[0].mxu1 %v1421_v20  ;;  %1233 = vmatmul.mubr.f32.vlgmr.msra.gmra.mrb[0].mxu0 %v1421_v20 }
  0x5b   :  { %1295 = vmatpush3.bf16.msra.mxu1 %v1292_v39  ;;  %1343 = vmatpush3.bf16.msra.mxu0 %v1551_v36  ;;  %v1304_v36 = vpack.c.bf16 %v1643_v10, %v1632_v0 }
  0x5c   :  { %1297 = vmatprep.subr.bf16.mxu1 %v1296_v52  ;;  %1345 = vmatprep.subr.bf16.mxu0 %v1565_v41 }
  0x5d   :  { %1169 = vmatprep.mubr.f32.mxu1 %v1425_v25  ;;  %1235 = vmatprep.mubr.f32.mxu0 %v1425_v25 }
  0x5e   :  { %1170 = vmatmul.mubr.f32.gmra.mrb[2].mxu1 %v1437_v35  ;;  %1236 = vmatmul.mubr.f32.gmra.mrb[2].mxu0 %v1437_v35 }
  0x5f   :  { %1299 = vmatpush3.bf16.msra.mxu1 %v1296_v52  ;;  %1347 = vmatpush3.bf16.msra.mxu0 %v1565_v41 }
  0x60   :  { %1301 = vmatprep.subr.bf16.mxu1 %v1300_v17  ;;  %1349 = vmatprep.subr.bf16.mxu0 %v1601_v27 }
  0x61   :  { %1188 = vmatprep.mubr.f32.mxu1 %v1415_v11  ;;  %1254 = vmatprep.mubr.f32.mxu0 %v1405_v5 }
  0x63   :  { %1303 = vmatpush3.bf16.msra.mxu1 %v1300_v17  ;;  %1351 = vmatpush3.bf16.msra.mxu0 %v1601_v27 }
  0x64   :  { %1305 = vmatprep.subr.bf16.mxu1 %v1304_v36  ;;  %1353 = vmatprep.subr.bf16.mxu0 %v1628_v62 }
  0x67   :  { %1307 = vmatpush3.bf16.msra.mxu1 %v1304_v36  ;;  %1355 = vmatpush3.bf16.msra.mxu0 %v1628_v62 }
  0x6a   :  { %1189 = vmatmul.mubr.f32.vlgmr.msra.gmra.mrb[0].mxu1 %v1428_v28  ;;  %1255 = vmatmul.mubr.f32.vlgmr.msra.gmra.mrb[0].mxu0 %v1421_v20 }
  0x6b   :  { %1191 = vmatprep.mubr.f32.mxu1 %v1434_v31  ;;  %1257 = vmatprep.mubr.f32.mxu0 %v1425_v25 }
  0x6e   :  { %1192 = vmatmul.mubr.f32.gmra.mrb[2].mxu1 %v1454_v44  ;;  %1258 = vmatmul.mubr.f32.gmra.mrb[2].mxu0 %v1437_v35 }
 0x13d   :  { %v1190_v5 = vpop.f32.mrb[0].mxu1  ;;  %v1256_v11 = vpop.f32.mrb[0].mxu0 }
 0x13e   :  { %v1356_v41 = vadd.f32 %v1256_v11, %v1190_v5  ;;  %v703_v14 = vpop.f32.mrb[1].mxu1  ;;  %v1021_v26 = vpop.f32.mrb[1].mxu0 }
 0x13f   :  { %v1357_v27 = vadd.f32 %v1021_v26, %v703_v14 }
 0x140   :  { %1044 = vst [vmem:[%s1707_s2 + $0x8] sm:$0xff] %v1356_v41 }
 0x141   :  { %1043 = vst [vmem:[%s1707_s2] sm:$0xff] %v1357_v27  ;;  %v1193_v20 = vpop.f32.mrb[2].mxu1  ;;  %v1259_v25 = vpop.f32.mrb[2].mxu0 }
 0x142   :  { %v1358_v28 = vadd.f32 %v1259_v25, %v1193_v20  ;;  %v717_v31 = vpop.f32.mrb[3].mxu1  ;;  %v1033_v44 = vpop.f32.mrb[3].mxu0 }
 0x143   :  { %v1359_v35 = vadd.f32 %v1033_v44, %v717_v31 }
 0x144   :  { %1046 = vst [vmem:[%s1707_s2 + $0x18] sm:$0xff] %v1358_v28 }
 0x145   :  { %1045 = vst [vmem:[%s1707_s2 + $0x10] sm:$0xff] %v1359_v35 }

</bundles_post_ra>
